<compile_context>
chip_gen: v6e
topology: v6e:2x2x1
jax: 0.10.0
libtpu: 0.0.40
codegen_flags: <defaults>
</compile_context>

<pallas_src>
from functools import partial

import jax
import jax.numpy as jnp
from jax.experimental import pallas as pl
from jax.experimental.pallas import tpu as pltpu


def _drop_path_kernel(scale_ref, x_ref, o_ref):
    # scale_ref: (Bt, 1) f32 per-sample scale (0.0 or 1/keep_prob)
    # x_ref/o_ref: (Bt, Tc) tile of the flattened (B, F) tensor.
    # Broadcast multiply in f32 (promotion handles bf16 inputs), cast once.
    o_ref[...] = (x_ref[...] * scale_ref[...]).astype(o_ref.dtype)


def _choose_tiles(B, F, itemsize, target_bytes=4 << 20):
    """Pick a (Bt, Tc) block ~target_bytes that satisfies TPU tiling rules."""
    # Lane (last) dim: multiple of 128, or the full extent F.
    lane_budget = max(128, ((target_bytes // (8 * itemsize)) // 128) * 128)
    if F <= lane_budget:
        tc = F                       # full extent — always legal, no lane tail
    else:
        tc = lane_budget             # multiple of 128; tail block (if any) masked
    row_bytes = max(1, tc * itemsize)
    bt = max(1, target_bytes // row_bytes)
    if bt >= B:
        bt = B                       # full batch extent — always legal
    else:
        bt = max(8, (bt // 8) * 8)   # sublane dim must be a multiple of 8
        if bt >= B:
            bt = B
    return int(bt), int(tc)


@partial(jax.jit, static_argnames=("drop_prob",))
def _drop_path_train(x, key, drop_prob):
    keep_prob = 1.0 - float(drop_prob)
    orig_shape = x.shape
    B = int(orig_shape[0])
    F = 1
    for d in orig_shape[1:]:
        F *= int(d)
    x2 = x.reshape(B, F)

    # Per-sample scale, precomputed outside the hot loop:
    #   scale = floor(keep_prob + u) / keep_prob   (0.0 or 1/keep_prob), f32.
    u = jax.random.uniform(key, (B,), dtype=jnp.float32)
    scale = (jnp.floor(keep_prob + u) * (1.0 / keep_prob)).reshape(B, 1)

    bt, tc = _choose_tiles(B, F, x.dtype.itemsize)
    grid = (pl.cdiv(B, bt), pl.cdiv(F, tc))

    y2 = pl.pallas_call(
        _drop_path_kernel,
        out_shape=jax.ShapeDtypeStruct((B, F), x.dtype),
        grid=grid,
        in_specs=[
            pl.BlockSpec((bt, 1), lambda i, j: (i, 0)),   # per-sample scale
            pl.BlockSpec((bt, tc), lambda i, j: (i, j)),  # lane-dense data tile
        ],
        out_specs=pl.BlockSpec((bt, tc), lambda i, j: (i, j)),
        compiler_params=pltpu.CompilerParams(
            dimension_semantics=("parallel", "parallel"),
            vmem_limit_bytes=48 * 1024 * 1024,
        ),
    )(scale, x2)
    return y2.reshape(orig_shape)


def drop_path(x, key, drop_prob: float = 0.0, training: bool = False):
    """DropPath forward. x: (B, ...) — per-sample stochastic depth."""
    if drop_prob == 0.0 or not training:
        return x
    return _drop_path_train(x, key, float(drop_prob))


class DropPath:
    """Drop paths (Stochastic Depth) per sample."""

    def __init__(self, drop_prob=None):
        self.drop_prob = drop_prob if drop_prob is not None else 0.0
        self.training = True

    def __call__(self, x, key):
        return drop_path(x, key, self.drop_prob, self.training)


if __name__ == "__main__":
    key = jax.random.PRNGKey(0)
    kx, kd = jax.random.split(key)

    B, N, C = 2, 8, 32
    x = jax.random.normal(kx, (B, N, C), dtype=jnp.float32)

    module = DropPath(drop_prob=0.25)
    module.training = True
    y = module(x, kd)
    y = jax.block_until_ready(y)

    # Reference check (pure JAX replica of the torch semantics, same uniforms).
    keep_prob = 1.0 - 0.25
    u = jax.random.uniform(kd, (B,), dtype=jnp.float32)
    mask = jnp.floor(keep_prob + u).reshape(B, 1, 1)
    y_ref = (x / keep_prob) * mask
    assert jnp.allclose(y, y_ref, atol=1e-6), "mismatch vs reference"

    # Eval mode / drop_prob=0 path is identity.
    module.training = False
    y_eval = jax.block_until_ready(module(x, kd))
    assert jnp.array_equal(y_eval, x)

    module_p0 = DropPath(drop_prob=0.0)
    y_p0 = jax.block_until_ready(module_p0(x, kd))
    assert jnp.array_equal(y_p0, x)

    print("KERNEL_OK")
</pallas_src>

<mosaic_0001>
module attributes {stable_mosaic.version = 11 : i64} {
  func.func @_drop_path_kernel(%arg0: i32, %arg1: i32, %arg2: memref<2x1xf32, #tpu.memory_space<vmem>>, %arg3: memref<2x256xf32, #tpu.memory_space<vmem>>, %arg4: memref<2x256xf32, #tpu.memory_space<vmem>>) attributes {dimension_semantics = [#tpu.dimension_semantics<parallel>, #tpu.dimension_semantics<parallel>], iteration_bounds = array<i64: 1, 1>, scalar_prefetch = 0 : i64, scratch_operands = 0 : i64, tpu.core_type = #tpu.core_type<tc>, window_params = [{transform_indices = @transform_0, window_bounds = array<i64: 2, 1>}, {transform_indices = @transform_1, window_bounds = array<i64: 2, 256>}, {transform_indices = @transform_2, window_bounds = array<i64: 2, 256>}]} {
    %c0 = arith.constant 0 : index
    %c0_0 = arith.constant 0 : index
    %0 = vector.load %arg3[%c0, %c0_0] : memref<2x256xf32, #tpu.memory_space<vmem>>, vector<2x256xf32>
    %c0_1 = arith.constant 0 : index
    %c0_2 = arith.constant 0 : index
    %1 = vector.load %arg2[%c0_1, %c0_2] : memref<2x1xf32, #tpu.memory_space<vmem>>, vector<2x1xf32>
    %2 = vector.broadcast %1 : vector<2x1xf32> to vector<2x256xf32>
    %3 = arith.mulf %0, %2 : vector<2x256xf32>
    %c0_3 = arith.constant 0 : index
    %c0_4 = arith.constant 0 : index
    %4 = vector.load %arg4[%c0_3, %c0_4] : memref<2x256xf32, #tpu.memory_space<vmem>>, vector<2x256xf32>
    tpu.vector_store %arg4[%c0_3, %c0_4], %3 {strides = array<i32>} : memref<2x256xf32, #tpu.memory_space<vmem>>, vector<2x256xf32>,
    return
  }
  func.func @transform_0(%arg0: i32, %arg1: i32) -> (i32, i32) {
    %c0_i32 = arith.constant 0 : i32
    %c0_i32_0 = arith.constant 0 : i32
    return %arg0, %c0_i32 : i32, i32
  }
  func.func @transform_1(%arg0: i32, %arg1: i32) -> (i32, i32) {
    %c0_i32 = arith.constant 0 : i32
    return %arg0, %arg1 : i32, i32
  }
  func.func @transform_2(%arg0: i32, %arg1: i32) -> (i32, i32) {
    %c0_i32 = arith.constant 0 : i32
    return %arg0, %arg1 : i32, i32
  }
}

</mosaic_0001>

<bundles_post_ra>
// kernel: _drop_path_train.1
= control target key start
LH: loop header
LB: loop body
LE: loop exit
PB: predicated region body
PF: predicated region fallthrough
CT: control target
= control target key end

     0   :  { %v34_v0 = vmov 0   ;;  %v35_v2 = vmov 269488144   ;;  %v20_v4 = vlaneseq  ;;  %s60_s0 = inlined_call_operand.vmem [shape: f32[2,1], index: 0, kind: input, shape index: {}]   ;;  %s61_s1 = inlined_call_operand.vmem [shape: f32[2,256], index: 1, kind: input, shape index: {}]   ;;  %s62_s2 = inlined_call_operand.vmem [shape: f32[2,256], index: 2, kind: output, shape index: {}]  }
   0x1   :  { %33 = vset.pattern.permute.xlu0 %v34_v0  ;;  %v12_v1 = vld [vmem:[%s60_s0] sm:$0x3]  ;;  %v18_v3 = vunpack.c.l.s4 %v35_v2 }
   0x2   :  { %15 = vperm.xlu0 %33, %v12_v1   ;;  %v21_v6 = vshrl.u32 %v20_v4, 7  ;;  %v11_v8 = vld [vmem:[%s61_s1] sm:$0xf] }
   0x3   :  { %v19_v5 = vunpack.c.0.s8 %v18_v3 }
   0x5   :  { %v22_v7 = vsub.s32 %v19_v5, %v21_v6 }
  0x7d   :  { %v16_v9 = vpop.permute.xlu0 %15 }
  0x7e   :  { %v23_v10 = vrot.slane %v16_v9, %v22_v7 }
  0x80   :  { %v25_v11 = vmul.f32 %v23_v10, %v11_v8 }
  0x82   :  { %26 = vst [vmem:[%s62_s2] sm:$0xf] %v25_v11 }

</bundles_post_ra>
